<compile_context>
chip_gen: v7x
topology: tpu7x:2x2x1
jax: 0.10.0
libtpu: 0.0.40
codegen_flags: <defaults>
</compile_context>

<pallas_src>
import jax
import jax.numpy as jnp
from jax.experimental import pallas as pl
from jax.experimental.pallas import tpu as pltpu

EPS = 1e-8
FS = 16000.0       # PerceptualEvaluationSpeechQuality(16000, 'wb')
FRAME = 256        # analysis frame (samples)
HOP = 128          # frame hop
NBINS = 128        # DFT bins k = 0..127 (0 .. ~8 kHz), lane-dense
NBARK = 49         # PESQ-wb Bark band count
NBARK_PAD = 128    # padded to lane width
F_PAD = 8          # frame count padded to a sublane multiple (frames / batch)
_TM_CAP = 1024     # max frame rows per signal per grid step


def _pesq_kernel(rows_ref, basis_ref, bark_ref, out_ref):
    tm = rows_ref.shape[0] // 2            # frame rows per signal in this block

    # One fused Hann-windowed DFT matmul for ref+deg stacked vertically:
    # (2*TM, 256) x (256, 256) bf16 inputs, f32 accumulation on the MXU.
    spec = jnp.dot(rows_ref[...], basis_ref[...],
                   preferred_element_type=jnp.float32)
    sr = spec[:tm]                         # ref  (TM, 2*NBINS) = [real | imag]
    sd = spec[tm:]                         # deg  (sublane-aligned split)

    rr, ri = sr[:, :NBINS], sr[:, NBINS:]
    dr, di = sd[:, :NBINS], sd[:, NBINS:]
    p_ref = rr * rr + ri * ri              # (TM, 128) power spectra, f32
    p_deg = dr * dr + di * di

    # Lane-concat at the vreg boundary -> (TM, 256); one K=256 Bark matmul with
    # a block-diagonal 0/1 matrix packs ref bands into lanes 0..48 and deg
    # bands into lanes 64..112 of a single (TM, 128) array.
    p_both = jnp.concatenate([p_ref, p_deg], axis=-1)
    b_both = jnp.dot(p_both.astype(jnp.bfloat16), bark_ref[...],
                     preferred_element_type=jnp.float32)

    # Zwicker loudness x^0.23 once over the packed array (2 EUP passes).
    # (On v6e/v7x this block could run in bf16 for ~2x EUP throughput.)
    l_both = jnp.exp(0.23 * jnp.log(b_both + EPS))
    # |l_deg - l_ref| per band: align ref/deg halves with a 64-lane roll
    # (XLU slot, essentially free).
    d_sym = jnp.abs(l_both - pltpu.roll(l_both, shift=64, axis=1))

    # Simplified PESQ asymmetry ((Bd+50)/(Br+50))^1.2, <3 -> 0, cap 12.
    # One log + one exp on the packed array; log-ratio via the same roll.
    lb50 = jnp.log(b_both + 50.0)
    asym = jnp.exp(1.2 * (lb50 - pltpu.roll(lb50, shift=64, axis=1)))
    asym = jnp.where(asym < 3.0, 0.0, jnp.minimum(asym, 12.0))
    d_asym = d_sym * asym                  # lanes 64..112 hold the correct ratio

    # Merge: symmetric disturbance in lanes 0..63, asymmetric in 64..127
    # (single unmasked lane-dense store), then reduce over each batch
    # element's F_PAD frames: (TM, 128) -> (bpb, F_PAD, 128) -> (bpb, 128).
    lane = jax.lax.broadcasted_iota(jnp.int32, d_sym.shape, 1)
    merged = jnp.where(lane < 64, d_sym, d_asym)
    bpb = out_ref.shape[0]
    out_ref[...] = jnp.sum(merged.reshape(bpb, F_PAD, NBARK_PAD), axis=1)


def _make_constants():
    n = jnp.arange(FRAME, dtype=jnp.float32)
    k = jnp.arange(NBINS, dtype=jnp.float32)
    win = 0.5 - 0.5 * jnp.cos(2.0 * jnp.pi * n / FRAME)         # Hann (FRAME,)
    ang = 2.0 * jnp.pi * n[:, None] * k[None, :] / FRAME
    basis = jnp.concatenate([jnp.cos(ang) * win[:, None],        # window folded in
                             -jnp.sin(ang) * win[:, None]], axis=1)   # (256, 256)

    # Block-diagonal Bark aggregation: rows 0..127 (ref bins) -> lanes 0..48,
    # rows 128..255 (deg bins) -> lanes 64..112; remaining lanes stay zero.
    freqs = k * FS / FRAME
    bark = (13.0 * jnp.arctan(0.00076 * freqs)
            + 3.5 * jnp.arctan((freqs / 7500.0) ** 2))
    band = jnp.clip(
        jnp.floor(bark / (bark[-1] * (1.0 + 1e-6)) * NBARK).astype(jnp.int32),
        0, NBARK - 1)
    lanes = jnp.arange(NBARK_PAD)[None, :]
    ref_half = (band[:, None] == lanes).astype(jnp.float32)
    deg_half = ((band[:, None] + 64) == lanes).astype(jnp.float32)
    bark_packed = jnp.concatenate([ref_half, deg_half], axis=0)  # (256, 128)
    return basis.astype(jnp.bfloat16), bark_packed.astype(jnp.bfloat16)


def _round_up(x, m):
    return ((x + m - 1) // m) * m


def _num_tensorcores():
    # Only used to decide whether an even >=2 block count helps (v7x megacore).
    try:
        info = pltpu.get_tpu_info()
        return int(getattr(info, "num_cores", getattr(info, "core_count", 1)))
    except Exception:
        return 1


def pesq_pallas(source, estimate_source):
    # PESQ.forward trimming semantics: crop the longer signal to the shorter.
    T = min(source.shape[-1], estimate_source.shape[-1])
    source = source[..., :T].astype(jnp.float32)
    estimate = estimate_source[..., :T].astype(jnp.float32)
    B = source.shape[0]

    # TODO(synk): ITU-T P.862 IIR input filter + active-speech level / time
    # alignment have no clean Pallas equivalent; approximated by RMS norm.
    def _norm(x):
        rms = jnp.sqrt(jnp.mean(x * x, axis=-1, keepdims=True) + EPS)
        return x / rms

    source = _norm(source)
    estimate = _norm(estimate)

    # Framing (glue).
    # TODO(synk): for long signals, frame in-kernel from the raw (B, T) signal
    # (HOP = FRAME/2 halo row or split-basis trick) instead of materializing
    # 2x-overlapping frames in HBM.
    F = (T - FRAME) // HOP + 1
    assert 1 <= F <= F_PAD
    idx = jnp.arange(F)[:, None] * HOP + jnp.arange(FRAME)[None, :]
    ref_fr = source[:, idx]                      # (B, F, FRAME)
    deg_fr = estimate[:, idx]

    # Block sizing: at most 7 padded batches; TM up to _TM_CAP frame rows per
    # step (double-buffered working set ~2 MiB, far below any VMEM ceiling).
    cap = _TM_CAP // F_PAD                               # max batches / block
    nblk_min = -(-B // cap)
    bpb = min(_round_up(-(-B // nblk_min), 8), cap)      # batches / block
    num_blocks = -(-B // bpb)
    # Only force an even >=2 block count on 2-TensorCore parts (v7x megacore);
    # on single-TC v5e/v6e a padded extra step is pure wasted serial work.
    if _num_tensorcores() >= 2:
        num_blocks = max(2, num_blocks + (num_blocks & 1))
    B_pad = num_blocks * bpb
    TM = bpb * F_PAD                                     # frame rows / signal

    def _pad(x):
        x = jnp.pad(x, ((0, B_pad - B), (0, F_PAD - F), (0, 0)))
        return x.reshape(num_blocks, TM, FRAME)

    # Stack ref on top of deg per block so one DFT matmul covers both signals.
    rows = jnp.concatenate([_pad(ref_fr), _pad(deg_fr)], axis=1)
    rows = rows.reshape(num_blocks * 2 * TM, FRAME).astype(jnp.bfloat16)

    basis, bark_packed = _make_constants()

    out = pl.pallas_call(
        _pesq_kernel,
        out_shape=jax.ShapeDtypeStruct((B_pad, NBARK_PAD), jnp.float32),
        grid_spec=pltpu.PrefetchScalarGridSpec(
            num_scalar_prefetch=0,
            grid=(num_blocks,),
            in_specs=[
                # stacked ref|deg frame rows for this block
                pl.BlockSpec((2 * TM, FRAME), lambda g: (g, 0)),
                # invariant constants: single-buffered, always block (0, 0)
                pl.BlockSpec((FRAME, 2 * NBINS), lambda g: (0, 0),
                             pipeline_mode=pl.Buffered(1)),
                pl.BlockSpec((2 * NBINS, NBARK_PAD), lambda g: (0, 0),
                             pipeline_mode=pl.Buffered(1)),
            ],
            out_specs=pl.BlockSpec((bpb, NBARK_PAD), lambda g: (g, 0)),
        ),
        compiler_params=pltpu.CompilerParams(
            dimension_semantics=("parallel",)),
    )(rows, basis, bark_packed)

    # Cognitive-model aggregation + MOS mapping (tiny glue; simplified).
    d_sym = jnp.sum(out[:B, :64], axis=-1) / (F * NBARK)
    d_asym = jnp.sum(out[:B, 64:], axis=-1) / (F * NBARK)
    mos = jnp.clip(4.5 - 0.1 * d_sym - 0.0309 * d_asym, -0.5, 4.5)
    # TODO(synk): full P.862 time alignment and MOS-LQO polynomial remapping not implemented.
    return jnp.mean(mos)   # scalar, matching torchmetrics' batch-mean reduction


if __name__ == "__main__":
    key = jax.random.PRNGKey(0)
    k1, k2 = jax.random.split(key)
    B, T_SRC, T_EST = 2, 1024, 1040
    source = jax.random.normal(k1, (B, T_SRC), dtype=jnp.float32)
    # estimate is longer than source -> exercises the trim branch of forward()
    estimate = jnp.pad(source, ((0, 0), (0, T_EST - T_SRC))) \
        + 0.1 * jax.random.normal(k2, (B, T_EST), dtype=jnp.float32)

    score = pesq_pallas(source, estimate)
    jax.block_until_ready(score)
    print("KERNEL_OK")
</pallas_src>

<mosaic_0001>
module attributes {stable_mosaic.version = 11 : i64} {
  func.func @_pesq_kernel(%arg0: i32, %arg1: memref<128x256xbf16, #tpu.memory_space<vmem>>, %arg2: memref<256x256xbf16, #tpu.memory_space<vmem>>, %arg3: memref<256x128xbf16, #tpu.memory_space<vmem>>, %arg4: memref<8x128xf32, #tpu.memory_space<vmem>>) attributes {dimension_semantics = [#tpu.dimension_semantics<parallel>], iteration_bounds = array<i64: 1>, scalar_prefetch = 0 : i64, scratch_operands = 0 : i64, tpu.core_type = #tpu.core_type<tc>, window_params = [{transform_indices = @transform_0, window_bounds = array<i64: 128, 256>}, {pipeline_mode = #tpu.pipeline_mode<synchronous>, transform_indices = @transform_1, window_bounds = array<i64: 256, 256>}, {pipeline_mode = #tpu.pipeline_mode<synchronous>, transform_indices = @transform_2, window_bounds = array<i64: 256, 128>}, {transform_indices = @transform_3, window_bounds = array<i64: 8, 128>}]} {
    %c0 = arith.constant 0 : index
    %c0_0 = arith.constant 0 : index
    %0 = vector.load %arg1[%c0, %c0_0] : memref<128x256xbf16, #tpu.memory_space<vmem>>, vector<128x256xbf16>
    %c0_1 = arith.constant 0 : index
    %c0_2 = arith.constant 0 : index
    %1 = vector.load %arg2[%c0_1, %c0_2] : memref<256x256xbf16, #tpu.memory_space<vmem>>, vector<256x256xbf16>
    %cst = arith.constant dense<0.000000e+00> : vector<128x256xf32>
    %2 = tpu.matmul %0, %1, %cst {dimension_numbers = #tpu.dot_dimension_numbers<[1], [0], [0], [1], [0, 0, 1, 1], [], []>} : vector<128x256xbf16>, vector<256x256xbf16>, vector<128x256xf32> -> vector<128x256xf32>
    %3 = vector.extract_strided_slice %2 {offsets = [0, 0], sizes = [64, 256], strides = [1, 1]} : vector<128x256xf32> to vector<64x256xf32>
    %4 = vector.extract_strided_slice %2 {offsets = [64, 0], sizes = [64, 256], strides = [1, 1]} : vector<128x256xf32> to vector<64x256xf32>
    %5 = vector.extract_strided_slice %3 {offsets = [0, 0], sizes = [64, 128], strides = [1, 1]} : vector<64x256xf32> to vector<64x128xf32>
    %6 = vector.extract_strided_slice %3 {offsets = [0, 128], sizes = [64, 128], strides = [1, 1]} : vector<64x256xf32> to vector<64x128xf32>
    %7 = vector.extract_strided_slice %4 {offsets = [0, 0], sizes = [64, 128], strides = [1, 1]} : vector<64x256xf32> to vector<64x128xf32>
    %8 = vector.extract_strided_slice %4 {offsets = [0, 128], sizes = [64, 128], strides = [1, 1]} : vector<64x256xf32> to vector<64x128xf32>
    %9 = arith.mulf %5, %5 : vector<64x128xf32>
    %10 = arith.mulf %6, %6 : vector<64x128xf32>
    %11 = arith.addf %9, %10 : vector<64x128xf32>
    %12 = arith.mulf %7, %7 : vector<64x128xf32>
    %13 = arith.mulf %8, %8 : vector<64x128xf32>
    %14 = arith.addf %12, %13 : vector<64x128xf32>
    %15 = tpu.concatenate %11, %14 in 1 : vector<64x128xf32>, vector<64x128xf32> -> vector<64x256xf32>
    %16 = arith.truncf %15 : vector<64x256xf32> to vector<64x256xbf16>
    %c0_3 = arith.constant 0 : index
    %c0_4 = arith.constant 0 : index
    %17 = vector.load %arg3[%c0_3, %c0_4] : memref<256x128xbf16, #tpu.memory_space<vmem>>, vector<256x128xbf16>
    %cst_5 = arith.constant dense<0.000000e+00> : vector<64x128xf32>
    %18 = tpu.matmul %16, %17, %cst_5 {dimension_numbers = #tpu.dot_dimension_numbers<[1], [0], [0], [1], [0, 0, 1, 1], [], []>} : vector<64x256xbf16>, vector<256x128xbf16>, vector<64x128xf32> -> vector<64x128xf32>
    %cst_6 = arith.constant 9.99999993E-9 : f32
    %19 = vector.broadcast %cst_6 : f32 to vector<64x128xf32>
    %20 = arith.addf %18, %19 : vector<64x128xf32>
    %21 = math.log %20 : vector<64x128xf32>
    %cst_7 = arith.constant 2.300000e-01 : f32
    %22 = vector.broadcast %cst_7 : f32 to vector<64x128xf32>
    %23 = arith.mulf %22, %21 : vector<64x128xf32>
    %24 = math.exp %23 : vector<64x128xf32>
    %c64_i32 = arith.constant 64 : i32
    %25 = tpu.dynamic_rotate %24 by %c64_i32 dim 1 : vector<64x128xf32>, i32 -> vector<64x128xf32>
    %26 = arith.subf %24, %25 : vector<64x128xf32>
    %27 = math.absf %26 : vector<64x128xf32>
    %cst_8 = arith.constant 5.000000e+01 : f32
    %28 = vector.broadcast %cst_8 : f32 to vector<64x128xf32>
    %29 = arith.addf %18, %28 : vector<64x128xf32>
    %30 = math.log %29 : vector<64x128xf32>
    %c64_i32_9 = arith.constant 64 : i32
    %31 = tpu.dynamic_rotate %30 by %c64_i32_9 dim 1 : vector<64x128xf32>, i32 -> vector<64x128xf32>
    %32 = arith.subf %30, %31 : vector<64x128xf32>
    %cst_10 = arith.constant 1.200000e+00 : f32
    %33 = vector.broadcast %cst_10 : f32 to vector<64x128xf32>
    %34 = arith.mulf %33, %32 : vector<64x128xf32>
    %35 = math.exp %34 : vector<64x128xf32>
    %cst_11 = arith.constant 3.000000e+00 : f32
    %36 = vector.broadcast %cst_11 : f32 to vector<64x128xf32>
    %37 = arith.cmpf olt, %35, %36 : vector<64x128xf32>
    %cst_12 = arith.constant 1.200000e+01 : f32
    %38 = vector.broadcast %cst_12 : f32 to vector<64x128xf32>
    %39 = arith.minimumf %35, %38 : vector<64x128xf32>
    %cst_13 = arith.constant 0.000000e+00 : f32
    %40 = vector.broadcast %cst_13 : f32 to vector<64x128xf32>
    %41 = arith.select %37, %40, %39 : vector<64x128xi1>, vector<64x128xf32>
    %42 = arith.mulf %27, %41 : vector<64x128xf32>
    %43 = tpu.iota {dimensions = array<i32: 1>} : vector<64x128xi32>
    %c64_i32_14 = arith.constant 64 : i32
    %44 = vector.broadcast %c64_i32_14 : i32 to vector<64x128xi32>
    %45 = arith.cmpi slt, %43, %44 : vector<64x128xi32>
    %46 = arith.select %45, %27, %42 : vector<64x128xi1>, vector<64x128xf32>
    %47 = vector.shape_cast %46 : vector<64x128xf32> to vector<8x8x128xf32>
    %cst_15 = arith.constant dense<0.000000e+00> : vector<8x128xf32>
    %48 = vector.multi_reduction <add>, %47, %cst_15 [1] : vector<8x8x128xf32> to vector<8x128xf32>
    %c0_16 = arith.constant 0 : index
    %c0_17 = arith.constant 0 : index
    %49 = vector.load %arg4[%c0_16, %c0_17] : memref<8x128xf32, #tpu.memory_space<vmem>>, vector<8x128xf32>
    tpu.vector_store %arg4[%c0_16, %c0_17], %48 {strides = array<i32>} : memref<8x128xf32, #tpu.memory_space<vmem>>, vector<8x128xf32>,
    return
  }
  func.func @transform_0(%arg0: i32) -> (i32, i32) {
    %c0_i32 = arith.constant 0 : i32
    %c0_i32_0 = arith.constant 0 : i32
    return %arg0, %c0_i32 : i32, i32
  }
  func.func @transform_1(%arg0: i32) -> (i32, i32) {
    %c0_i32 = arith.constant 0 : i32
    %c0_i32_0 = arith.constant 0 : i32
    %c0_i32_1 = arith.constant 0 : i32
    return %c0_i32, %c0_i32_0 : i32, i32
  }
  func.func @transform_2(%arg0: i32) -> (i32, i32) {
    %c0_i32 = arith.constant 0 : i32
    %c0_i32_0 = arith.constant 0 : i32
    %c0_i32_1 = arith.constant 0 : i32
    return %c0_i32, %c0_i32_0 : i32, i32
  }
  func.func @transform_3(%arg0: i32) -> (i32, i32) {
    %c0_i32 = arith.constant 0 : i32
    %c0_i32_0 = arith.constant 0 : i32
    return %arg0, %c0_i32 : i32, i32
  }
}

</mosaic_0001>

<bundles_post_ra>
// kernel: tpu_custom_call.1
= control target key start
LH: loop header
LB: loop body
LE: loop exit
PB: predicated region body
PF: predicated region fallthrough
CT: control target
= control target key end

     0   :  { %8 = vsyncpa [#allocation3], 0  ;;  %s1535_s0 = inlined_call_operand.hbm [shape: bf16[128,256], index: 0, kind: input, shape index: {}]   ;;  %s1536_s1 = inlined_call_operand.hbm [shape: bf16[256,256], index: 1, kind: input, shape index: {}]   ;;  %s1537_s2 = inlined_call_operand.hbm [shape: bf16[256,128], index: 2, kind: input, shape index: {}]   ;;  %s1538_s3 = inlined_call_operand.hbm [shape: f32[8,128], index: 3, kind: output, shape index: {}]  }
   0x1   :  { %9 = vsyncpa [#allocation6], 0 }
   0x2   :  { %10 = vsyncpa [#allocation4], 0  ;;  %s1348_s12 = smov [#allocation5]   ;;  %s1349_s14 = smov [#allocation2]  }
   0x3   :  { %s28_s13 = sshll.u32 %s1348_s12, 4  ;;  %s16_s15 = sshll.u32 %s1349_s14, 4  ;;  %s29_s13 = int_to_ptr.vmem [resolvable:$true] %s28_s13  ;;  %s1376_s15 = int_to_ptr.vmem [resolvable:$true] %s16_s15 }
   0x4   :  { %s1254_s18 = scalar_lea.hbm %s1536_s1, 4096 }
   0x5   :  { %p1255_p0 = scmp.ne.s32.totalorder %s1536_s1, %s1254_s18  ;;  %p1258_p1 = scmp.lt.u32.totalorder %s1254_s18, %s1536_s1 }
   0x7   :  { %p1260_p2 = pnand %p1258_p1, %p1255_p0 }
   0x9   :  { %1263 = shalt.err (!%p1260_p2)
}
   0xa   :  { %s1264_s23 = scalar_lea.vmem %s29_s13, 4096  ;;  %p1269_p4 = scmp.lt.s32.totalorder %s29_s13, %s29_s13 }
   0xb   :  { %p1265_p3 = scmp.ne.s32.totalorder %s29_s13, %s1264_s23  ;;  %p1270_p5 = scmp.lt.s32.totalorder %s1264_s23, %s1264_s23 }
   0xd   :  { %p1271_p6 = por %p1270_p5, %p1269_p4 }
   0xf   :  { %p1272_p7 = pnand %p1271_p6, %p1265_p3 }
  0x11   :  { %1275 = shalt.err (!%p1272_p7)
}
  0x12   :  { %s1350_s24 = smov 128   ;;  %s1351_s25 = smov 8  }
  0x13   :  { %34 = dma.hbm_to_vmem [thread:$0]  %s1536_s1, 4096, %s29_s13, [#allocation6], %s1350_s24, %s1350_s24, %s1351_s25  }
  0x14   :  { %s1276_s30 = scalar_lea.hbm %s1535_s0, 2048 }
  0x15   :  { %p1277_p8 = scmp.ne.s32.totalorder %s1535_s0, %s1276_s30  ;;  %p1280_p9 = scmp.lt.u32.totalorder %s1276_s30, %s1535_s0 }
  0x17   :  { %p1282_p10 = pnand %p1280_p9, %p1277_p8 }
  0x19   :  { %1285 = shalt.err (!%p1282_p10)
}
  0x1a   :  { %s1286_s8 = scalar_lea.vmem %s1376_s15, 2048  ;;  %p1291_p12 = scmp.lt.s32.totalorder %s1376_s15, %s1376_s15 }
  0x1b   :  { %p1287_p11 = scmp.ne.s32.totalorder %s1376_s15, %s1286_s8  ;;  %p1292_p13 = scmp.lt.s32.totalorder %s1286_s8, %s1286_s8 }
  0x1d   :  { %p1293_p0 = por %p1292_p13, %p1291_p12 }
  0x1f   :  { %p1294_p1 = pnand %p1293_p0, %p1287_p11 }
  0x21   :  { %1297 = shalt.err (!%p1294_p1)
}
  0x22   :  { %22 = dma.hbm_to_vmem [thread:$0]  %s1535_s0, 2048, %s1376_s15, [#allocation3], %s1350_s24, %s1350_s24, %s1351_s25  }
  0x23   :  { %s1352_s10 = smov [#allocation7]   ;;  %s1298_s14 = scalar_lea.hbm %s1537_s2, 2048 }
  0x24   :  { %s40_s11 = sshll.u32 %s1352_s10, 4  ;;  %p1299_p2 = scmp.ne.s32.totalorder %s1537_s2, %s1298_s14  ;;  %s41_s11 = int_to_ptr.vmem [resolvable:$true] %s40_s11 }
  0x25   :  { %p1302_p3 = scmp.lt.u32.totalorder %s1298_s14, %s1537_s2 }
  0x27   :  { %p1304_p4 = pnand %p1302_p3, %p1299_p2 }
  0x29   :  { %1307 = shalt.err (!%p1304_p4)
}
  0x2a   :  { %s1308_s20 = scalar_lea.vmem %s41_s11, 2048  ;;  %p1313_p6 = scmp.lt.s32.totalorder %s41_s11, %s41_s11 }
  0x2b   :  { %p1309_p5 = scmp.ne.s32.totalorder %s41_s11, %s1308_s20  ;;  %p1314_p7 = scmp.lt.s32.totalorder %s1308_s20, %s1308_s20 }
  0x2d   :  { %p1315_p8 = por %p1314_p7, %p1313_p6 }
  0x2f   :  { %p1316_p9 = pnand %p1315_p8, %p1309_p5 }
  0x31   :  { %1319 = shalt.err (!%p1316_p9)
}
  0x32   :  { %s1353_s0 = smov 64   ;;  %s1354_s15 = smov 4  }
  0x33   :  { %46 = dma.hbm_to_vmem [thread:$0]  %s1537_s2, 2048, %s41_s11, [#allocation6], %s1353_s0, %s1353_s0, %s1354_s15  }
  0x34   :  { %1342 = dma.done.wait [#allocation3], 2048  }
  0x35   :  { %1343 = vsyncadd [#allocation3], 4294965248 }
  0x36   :  { %1344 = dma.done.wait [#allocation6], 6144  }
  0x37   :  { %1345 = vsyncadd [#allocation6], 4294961152  ;;  %v1102_v0 = vld [vmem:[#allocation5 + $0x4] ss:$8 sps:$4 sm:$0xff]   ;;  %v1104_v1 = vld [vmem:[#allocation5] ss:$8 sps:$4 sm:$0xff]  }
  0x38   :  { %345 = vmatprep.subr.bf16.mxu0 %v1102_v0  ;;  %v1105_v2 = vld [vmem:[#allocation5 + $0x14] ss:$8 sps:$4 sm:$0xff]   ;;  %v1107_v3 = vld [vmem:[#allocation5 + $0x10] ss:$8 sps:$4 sm:$0xff]   ;;  %v1108_v4 = vld [vmem:[#allocation5 + $0x24] ss:$8 sps:$4 sm:$0xff]  }
  0x39   :  { %346 = vmatpush1.bf16.msra.mxu0 %v1104_v1  ;;  %v1110_v5 = vld [vmem:[#allocation5 + $0x20] ss:$8 sps:$4 sm:$0xff]   ;;  %v1111_v6 = vld [vmem:[#allocation5 + $0x34] ss:$8 sps:$4 sm:$0xff]   ;;  %v1113_v7 = vld [vmem:[#allocation5 + $0x30] ss:$8 sps:$4 sm:$0xff]  }
  0x3a   :  { %347 = vmatprep.subr.bf16.mxu0 %v1105_v2  ;;  %v1114_v8 = vld [vmem:[#allocation5 + $0x44] ss:$8 sps:$4 sm:$0xff]   ;;  %v1116_v9 = vld [vmem:[#allocation5 + $0x40] ss:$8 sps:$4 sm:$0xff]   ;;  %v1117_v10 = vld [vmem:[#allocation5 + $0x54] ss:$8 sps:$4 sm:$0xff]  }
  0x3b   :  { %v1119_v11 = vld [vmem:[#allocation5 + $0x50] ss:$8 sps:$4 sm:$0xff]   ;;  %v1120_v12 = vld [vmem:[#allocation5 + $0x64] ss:$8 sps:$4 sm:$0xff]   ;;  %v1122_v14 = vld [vmem:[#allocation5 + $0x60] ss:$8 sps:$4 sm:$0xff]  }
  0x3c   :  { %v1152_v13 = vld [vmem:[#allocation2 + $0x4] ss:$8 sps:$4 sm:$0xff]   ;;  %v1123_v15 = vld [vmem:[#allocation5 + $0x74] ss:$8 sps:$4 sm:$0xff]   ;;  %v1125_v16 = vld [vmem:[#allocation5 + $0x70] ss:$8 sps:$4 sm:$0xff]  }
  0x3d   :  { %348 = vmatpush1.bf16.msra.mxu0 %v1107_v3  ;;  %377 = vmatprep.mubr.bf16.mxu0 %v1152_v13  ;;  %v1126_v17 = vld [vmem:[#allocation5 + $0x84] ss:$8 sps:$4 sm:$0xff]   ;;  %v1128_v18 = vld [vmem:[#allocation5 + $0x80] ss:$8 sps:$4 sm:$0xff]   ;;  %v1129_v19 = vld [vmem:[#allocation5 + $0x94] ss:$8 sps:$4 sm:$0xff]  }
  0x3e   :  { %349 = vmatprep.subr.bf16.mxu0 %v1108_v4  ;;  %v1131_v20 = vld [vmem:[#allocation5 + $0x90] ss:$8 sps:$4 sm:$0xff]   ;;  %v1132_v21 = vld [vmem:[#allocation5 + $0xa4] ss:$8 sps:$4 sm:$0xff]   ;;  %v1134_v22 = vld [vmem:[#allocation5 + $0xa0] ss:$8 sps:$4 sm:$0xff]  }
  0x3f   :  { %v1135_v23 = vld [vmem:[#allocation5 + $0xb4] ss:$8 sps:$4 sm:$0xff]   ;;  %v1137_v24 = vld [vmem:[#allocation5 + $0xb0] ss:$8 sps:$4 sm:$0xff]   ;;  %v1138_v25 = vld [vmem:[#allocation5 + $0xc4] ss:$8 sps:$4 sm:$0xff]  }
  0x40   :  { %v1140_v26 = vld [vmem:[#allocation5 + $0xc0] ss:$8 sps:$4 sm:$0xff]   ;;  %v1141_v27 = vld [vmem:[#allocation5 + $0xd4] ss:$8 sps:$4 sm:$0xff]   ;;  %v1143_v28 = vld [vmem:[#allocation5 + $0xd0] ss:$8 sps:$4 sm:$0xff]  }
  0x41   :  { %350 = vmatpush1.bf16.msra.mxu0 %v1110_v5  ;;  %v1144_v29 = vld [vmem:[#allocation5 + $0xe4] ss:$8 sps:$4 sm:$0xff]   ;;  %v1146_v30 = vld [vmem:[#allocation5 + $0xe0] ss:$8 sps:$4 sm:$0xff]   ;;  %v1147_v31 = vld [vmem:[#allocation5 + $0xf4] ss:$8 sps:$4 sm:$0xff]  }
  0x42   :  { %351 = vmatprep.subr.bf16.mxu0 %v1111_v6  ;;  %v1149_v32 = vld [vmem:[#allocation5 + $0xf0] ss:$8 sps:$4 sm:$0xff]   ;;  %v1150_v33 = vld [vmem:[#allocation2] ss:$8 sps:$4 sm:$0xff]   ;;  %v1153_v34 = vld [vmem:[#allocation2 + $0x14] ss:$8 sps:$4 sm:$0xff]  }
  0x43   :  { %v1155_v35 = vld [vmem:[#allocation2 + $0x10] ss:$8 sps:$4 sm:$0xff]   ;;  %v1156_v36 = vld [vmem:[#allocation2 + $0x24] ss:$8 sps:$4 sm:$0xff]   ;;  %v1158_v37 = vld [vmem:[#allocation2 + $0x20] ss:$8 sps:$4 sm:$0xff]  }
  0x44   :  { %v1159_v38 = vld [vmem:[#allocation2 + $0x34] ss:$8 sps:$4 sm:$0xff]   ;;  %v1161_v39 = vld [vmem:[#allocation2 + $0x30] ss:$8 sps:$4 sm:$0xff]   ;;  %v1162_v40 = vld [vmem:[#allocation2 + $0x44] ss:$8 sps:$4 sm:$0xff]  }
  0x45   :  { %352 = vmatpush1.bf16.msra.mxu0 %v1113_v7  ;;  %v1164_v41 = vld [vmem:[#allocation2 + $0x40] ss:$8 sps:$4 sm:$0xff]   ;;  %v1165_v42 = vld [vmem:[#allocation2 + $0x54] ss:$8 sps:$4 sm:$0xff]   ;;  %v1167_v43 = vld [vmem:[#allocation2 + $0x50] ss:$8 sps:$4 sm:$0xff]  }
  0x46   :  { %353 = vmatprep.subr.bf16.mxu0 %v1114_v8  ;;  %v1168_v44 = vld [vmem:[#allocation2 + $0x64] ss:$8 sps:$4 sm:$0xff]   ;;  %v1170_v45 = vld [vmem:[#allocation2 + $0x60] ss:$8 sps:$4 sm:$0xff]   ;;  %v1171_v46 = vld [vmem:[#allocation2 + $0x74] ss:$8 sps:$4 sm:$0xff]  }
  0x47   :  { %v1173_v47 = vld [vmem:[#allocation2 + $0x70] ss:$8 sps:$4 sm:$0xff]   ;;  %v1174_v48 = vld [vmem:[#allocation7 + $0x40] sm:$0xff]   ;;  %v1176_v50 = vld [vmem:[#allocation7 + $0x48] sm:$0xff]   ;;  %vm958_vm7 = vcmask 1041409   ;;  %vm960_vm9 = vcmask 1042434  }
  0x48   :  { %v1175_v49 = vld [vmem:[#allocation7] sm:$0xff]   ;;  %1054 = vmatprep.subr.bf16.mxu1 %v1174_v48  ;;  %v1177_v51 = vld [vmem:[#allocation7 + $0x8] sm:$0xff]   ;;  %v1178_v52 = vld [vmem:[#allocation7 + $0x50] sm:$0xff]   ;;  %vm962_vm11 = vcmask 1043459   ;;  %vm964_vm12 = vcmask 1044484   ;;  %vm966_vm13 = vcmask 1045509  }
  0x49   :  { %354 = vmatpush1.bf16.msra.mxu0 %v1116_v9  ;;  %1055 = vmatpush3.bf16.msra.mxu1 %v1175_v49  ;;  %v1179_v53 = vld [vmem:[#allocation7 + $0x10] sm:$0xff]   ;;  %v1180_v54 = vld [vmem:[#allocation7 + $0x58] sm:$0xff]   ;;  %v1182_v56 = vld [vmem:[#allocation7 + $0x60] sm:$0xff]   ;;  %vm968_vm14 = vcmask 1046534   ;;  %s1355_s2 = smov [#allocation8]   ;;  %vm970_vm15 = vcmask 1047559  }
  0x4a   :  { %355 = vmatprep.subr.bf16.mxu0 %v1117_v10  ;;  %1056 = vmatprep.subr.bf16.mxu1 %v1176_v50  ;;  %v1181_v55 = vld [vmem:[#allocation7 + $0x18] sm:$0xff]   ;;  %v1183_v57 = vld [vmem:[#allocation7 + $0x20] sm:$0xff]   ;;  %v1184_v58 = vld [vmem:[#allocation7 + $0x68] sm:$0xff]   ;;  %s980_s23 = sshll.u32 %s1355_s2, 4  ;;  %s981_s23 = int_to_ptr.vmem [resolvable:$true] %s980_s23 }
  0x4b   :  { %v1185_v59 = vld [vmem:[#allocation7 + $0x28] sm:$0xff]   ;;  %v1186_v60 = vld [vmem:[#allocation7 + $0x70] sm:$0xff]   ;;  %v1188_v62 = vld [vmem:[#allocation7 + $0x78] sm:$0xff]   ;;  %s1320_s24 = scalar_lea.vmem %s981_s23, 128  ;;  %p1325_p11 = scmp.lt.s32.totalorder %s981_s23, %s981_s23 }
  0x4c   :  { %v1187_v61 = vld [vmem:[#allocation7 + $0x30] sm:$0xff]   ;;  %v1189_v63 = vld [vmem:[#allocation7 + $0x38] sm:$0xff]   ;;  %p1321_p10 = scmp.ne.s32.totalorder %s981_s23, %s1320_s24  ;;  %p1326_p12 = scmp.lt.s32.totalorder %s1320_s24, %s1320_s24 }
  0x4d   :  { %356 = vmatpush1.bf16.msra.mxu0 %v1119_v11  ;;  %1057 = vmatpush3.bf16.msra.mxu1 %v1177_v51 }
  0x4e   :  { %357 = vmatprep.subr.bf16.mxu0 %v1120_v12  ;;  %1058 = vmatprep.subr.bf16.mxu1 %v1178_v52  ;;  %p1327_p13 = por %p1326_p12, %p1325_p11 }
  0x50   :  { %p1328_p0 = pnand %p1327_p13, %p1321_p10 }
  0x51   :  { %358 = vmatpush1.bf16.msra.mxu0 %v1122_v14  ;;  %1059 = vmatpush3.bf16.msra.mxu1 %v1179_v53 }
  0x52   :  { %359 = vmatprep.subr.bf16.mxu0 %v1123_v15  ;;  %1060 = vmatprep.subr.bf16.mxu1 %v1180_v54 }
  0x55   :  { %360 = vmatpush1.bf16.msra.mxu0 %v1125_v16  ;;  %1061 = vmatpush3.bf16.msra.mxu1 %v1181_v55 }
  0x56   :  { %361 = vmatprep.subr.bf16.mxu0 %v1126_v17  ;;  %1062 = vmatprep.subr.bf16.mxu1 %v1182_v56 }
  0x59   :  { %362 = vmatpush1.bf16.msra.mxu0 %v1128_v18  ;;  %1063 = vmatpush3.bf16.msra.mxu1 %v1183_v57 }
  0x5a   :  { %363 = vmatprep.subr.bf16.mxu0 %v1129_v19  ;;  %1064 = vmatprep.subr.bf16.mxu1 %v1184_v58 }
  0x5d   :  { %364 = vmatpush1.bf16.msra.mxu0 %v1131_v20  ;;  %1065 = vmatpush3.bf16.msra.mxu1 %v1185_v59 }
  0x5e   :  { %365 = vmatprep.subr.bf16.mxu0 %v1132_v21  ;;  %1066 = vmatprep.subr.bf16.mxu1 %v1186_v60 }
  0x61   :  { %366 = vmatpush1.bf16.msra.mxu0 %v1134_v22  ;;  %1067 = vmatpush3.bf16.msra.mxu1 %v1187_v61 }
  0x62   :  { %367 = vmatprep.subr.bf16.mxu0 %v1135_v23  ;;  %1068 = vmatprep.subr.bf16.mxu1 %v1188_v62 }
  0x65   :  { %368 = vmatpush1.bf16.msra.mxu0 %v1137_v24  ;;  %1069 = vmatpush3.bf16.msra.mxu1 %v1189_v63 }
  0x66   :  { %369 = vmatprep.subr.bf16.mxu0 %v1138_v25 }
  0x69   :  { %370 = vmatpush1.bf16.msra.mxu0 %v1140_v26 }
  0x6a   :  { %371 = vmatprep.subr.bf16.mxu0 %v1141_v27 }
  0x6d   :  { %372 = vmatpush1.bf16.msra.mxu0 %v1143_v28 }
  0x6e   :  { %373 = vmatprep.subr.bf16.mxu0 %v1144_v29 }
  0x71   :  { %374 = vmatpush1.bf16.msra.mxu0 %v1146_v30 }
  0x72   :  { %375 = vmatprep.subr.bf16.mxu0 %v1147_v31 }
  0x75   :  { %376 = vmatpush1.bf16.msra.mxu0 %v1149_v32 }
  0x78   :  { %378 = vmatmul.mubr.bf16.vlgmr.msra.gmra.mrb[0].mxu0 %v1150_v33 }
  0x79   :  { %387 = vmatprep.mubr.bf16.mxu0 %v1153_v34 }
  0x80   :  { %388 = vmatmul.mubr.bf16.gmra.mrb[4].mxu0 %v1155_v35 }
  0x81   :  { %397 = vmatprep.mubr.bf16.mxu0 %v1156_v36 }
  0x88   :  { %398 = vmatmul.mubr.bf16.gmra.mrb[8].mxu0 %v1158_v37 }
  0x89   :  { %407 = vmatprep.mubr.bf16.mxu0 %v1159_v38 }
  0x90   :  { %408 = vmatmul.mubr.bf16.gmra.mrb[12].mxu0 %v1161_v39 }
  0x91   :  { %417 = vmatprep.mubr.bf16.mxu0 %v1162_v40 }
  0x98   :  { %418 = vmatmul.mubr.bf16.gmra.mrb[16].mxu0 %v1164_v41 }
  0x99   :  { %427 = vmatprep.mubr.bf16.mxu0 %v1165_v42 }
  0xa0   :  { %428 = vmatmul.mubr.bf16.gmra.mrb[20].mxu0 %v1167_v43 }
  0xa1   :  { %437 = vmatprep.mubr.bf16.mxu0 %v1168_v44 }
  0xa8   :  { %438 = vmatmul.mubr.bf16.gmra.mrb[24].mxu0 %v1170_v45 }
  0xa9   :  { %447 = vmatprep.mubr.bf16.mxu0 %v1171_v46 }
  0xb0   :  { %448 = vmatmul.mubr.bf16.gmra.mrb[28].mxu0 %v1173_v47 }
 0x14b   :  { %v379_v0 = vpop.f32.mrb[0].mxu0 }
 0x14c   :  { %v458_v1 = vmul.f32 %v379_v0, %v379_v0  ;;  %v381_v2 = vpop.f32.mrb[1].mxu0 }
 0x14d   :  { %v466_v3 = vmul.f32 %v381_v2, %v381_v2  ;;  %v383_v4 = vpop.f32.mrb[2].mxu0 }
 0x14e   :  { %v459_v5 = vmul.f32 %v383_v4, %v383_v4  ;;  %v385_v6 = vpop.f32.mrb[3].mxu0 }
 0x14f   :  { %v474_v7 = vadd.f32 %v466_v3, %v458_v1  ;;  %v467_v8 = vmul.f32 %v385_v6, %v385_v6 }
 0x151   :  { %v475_v9 = vadd.f32 %v467_v8, %v459_v5 }
 0x153   :  { %v389_v10 = vpop.f32.mrb[4].mxu0  ;;  %v506_v11 = vpack.c.bf16 %v475_v9, %v474_v7 }
 0x154   :  { %v460_v12 = vmul.f32 %v389_v10, %v389_v10  ;;  %v391_v13 = vpop.f32.mrb[5].mxu0 }
 0x155   :  { %v468_v14 = vmul.f32 %v391_v13, %v391_v13  ;;  %v393_v15 = vpop.f32.mrb[6].mxu0 }
 0x156   :  { %v461_v16 = vmul.f32 %v393_v15, %v393_v15  ;;  %v395_v17 = vpop.f32.mrb[7].mxu0 }
 0x157   :  { %v476_v18 = vadd.f32 %v468_v14, %v460_v12  ;;  %v469_v19 = vmul.f32 %v395_v17, %v395_v17 }
 0x159   :  { %v477_v20 = vadd.f32 %v469_v19, %v461_v16 }
 0x15b   :  { %v399_v21 = vpop.f32.mrb[8].mxu0  ;;  %v508_v22 = vpack.c.bf16 %v477_v20, %v476_v18 }
 0x15c   :  { %v462_v23 = vmul.f32 %v399_v21, %v399_v21  ;;  %v401_v24 = vpop.f32.mrb[9].mxu0 }
 0x15d   :  { %v470_v25 = vmul.f32 %v401_v24, %v401_v24  ;;  %v403_v26 = vpop.f32.mrb[10].mxu0 }
 0x15e   :  { %v463_v27 = vmul.f32 %v403_v26, %v403_v26  ;;  %v405_v28 = vpop.f32.mrb[11].mxu0 }
 0x15f   :  { %v478_v29 = vadd.f32 %v470_v25, %v462_v23  ;;  %v471_v30 = vmul.f32 %v405_v28, %v405_v28 }
 0x161   :  { %v479_v31 = vadd.f32 %v471_v30, %v463_v27 }
 0x163   :  { %v409_v32 = vpop.f32.mrb[12].mxu0  ;;  %v510_v33 = vpack.c.bf16 %v479_v31, %v478_v29 }
 0x164   :  { %v464_v34 = vmul.f32 %v409_v32, %v409_v32  ;;  %v411_v35 = vpop.f32.mrb[13].mxu0 }
 0x165   :  { %v472_v36 = vmul.f32 %v411_v35, %v411_v35  ;;  %v413_v37 = vpop.f32.mrb[14].mxu0 }
 0x166   :  { %v465_v38 = vmul.f32 %v413_v37, %v413_v37  ;;  %v415_v39 = vpop.f32.mrb[15].mxu0 }
 0x167   :  { %v480_v40 = vadd.f32 %v472_v36, %v464_v34  ;;  %v473_v41 = vmul.f32 %v415_v39, %v415_v39 }
 0x169   :  { %v481_v42 = vadd.f32 %v473_v41, %v465_v38 }
 0x16b   :  { %v419_v43 = vpop.f32.mrb[16].mxu0  ;;  %v512_v44 = vpack.c.bf16 %v481_v42, %v480_v40 }
 0x16c   :  { %v482_v45 = vmul.f32 %v419_v43, %v419_v43  ;;  %v421_v46 = vpop.f32.mrb[17].mxu0 }
 0x16d   :  { %v490_v47 = vmul.f32 %v421_v46, %v421_v46  ;;  %v423_v48 = vpop.f32.mrb[18].mxu0 }
 0x16e   :  { %v483_v49 = vmul.f32 %v423_v48, %v423_v48  ;;  %v425_v50 = vpop.f32.mrb[19].mxu0 }
 0x16f   :  { %v491_v51 = vmul.f32 %v425_v50, %v425_v50  ;;  %v498_v52 = vadd.f32 %v490_v47, %v482_v45 }
 0x171   :  { %v499_v53 = vadd.f32 %v491_v51, %v483_v49 }
 0x173   :  { %v429_v54 = vpop.f32.mrb[20].mxu0  ;;  %v507_v55 = vpack.c.bf16 %v499_v53, %v498_v52 }
 0x174   :  { %v484_v56 = vmul.f32 %v429_v54, %v429_v54  ;;  %v431_v57 = vpop.f32.mrb[21].mxu0 }
 0x175   :  { %v492_v58 = vmul.f32 %v431_v57, %v431_v57  ;;  %v433_v59 = vpop.f32.mrb[22].mxu0  ;;  %674 = vmatprep.mubr.bf16.mxu1 %v507_v55 }
 0x176   :  { %v485_v60 = vmul.f32 %v433_v59, %v433_v59  ;;  %v435_v61 = vpop.f32.mrb[23].mxu0  ;;  %675 = vmatmul.mubr.bf16.vlgmr.msra.gmra.mrb[0].mxu1 %v506_v11 }
 0x177   :  { %v500_v62 = vadd.f32 %v492_v58, %v484_v56  ;;  %v493_v63 = vmul.f32 %v435_v61, %v435_v61 }
 0x179   :  { %v501_v0 = vadd.f32 %v493_v63, %v485_v60 }
 0x17b   :  { %v439_v1 = vpop.f32.mrb[24].mxu0  ;;  %v509_v2 = vpack.c.bf16 %v501_v0, %v500_v62 }
 0x17c   :  { %v486_v3 = vmul.f32 %v439_v1, %v439_v1  ;;  %v441_v4 = vpop.f32.mrb[25].mxu0 }
 0x17d   :  { %v494_v5 = vmul.f32 %v441_v4, %v441_v4  ;;  %v443_v6 = vpop.f32.mrb[26].mxu0  ;;  %682 = vmatprep.mubr.bf16.mxu1 %v509_v2 }
 0x17e   :  { %v487_v7 = vmul.f32 %v443_v6, %v443_v6  ;;  %v445_v8 = vpop.f32.mrb[27].mxu0  ;;  %683 = vmatmul.mubr.bf16.gmra.mrb[4].mxu1 %v508_v22 }
 0x17f   :  { %v502_v9 = vadd.f32 %v494_v5, %v486_v3  ;;  %v495_v10 = vmul.f32 %v445_v8, %v445_v8 }
 0x181   :  { %v503_v12 = vadd.f32 %v495_v10, %v487_v7 }
 0x183   :  { %v449_v13 = vpop.f32.mrb[28].mxu0  ;;  %v511_v14 = vpack.c.bf16 %v503_v12, %v502_v9 }
 0x184   :  { %v488_v15 = vmul.f32 %v449_v13, %v449_v13  ;;  %v451_v11 = vpop.f32.mrb[29].mxu0 }
 0x185   :  { %v496_v16 = vmul.f32 %v451_v11, %v451_v11  ;;  %v453_v17 = vpop.f32.mrb[30].mxu0  ;;  %690 = vmatprep.mubr.bf16.mxu1 %v511_v14 }
 0x186   :  { %v489_v18 = vmul.f32 %v453_v17, %v453_v17  ;;  %v455_v19 = vpop.f32.mrb[31].mxu0  ;;  %691 = vmatmul.mubr.bf16.gmra.mrb[8].mxu1 %v510_v33 }
 0x187   :  { %v504_v20 = vadd.f32 %v496_v16, %v488_v15  ;;  %v497_v21 = vmul.f32 %v455_v19, %v455_v19 }
 0x189   :  { %v505_v23 = vadd.f32 %v497_v21, %v489_v18 }
 0x18b   :  { %v513_v24 = vpack.c.bf16 %v505_v23, %v504_v20 }
 0x18d   :  { %698 = vmatprep.mubr.bf16.mxu1 %v513_v24 }
 0x18e   :  { %699 = vmatmul.mubr.bf16.gmra.mrb[12].mxu1 %v512_v44 }
 0x249   :  { %v1070_v22 = vpop.f32.mrb[0].mxu1 }
 0x24a   :  { %v1071_v25 = vpop.f32.mrb[1].mxu1 }
 0x24b   :  { %v1072_v26 = vadd.f32 %v1071_v25, %v1070_v22  ;;  %v1073_v27 = vpop.f32.mrb[2].mxu1 }
 0x24c   :  { %v1074_v28 = vpop.f32.mrb[3].mxu1 }
 0x24d   :  { %v787_v29 = vadd.f32 50.0, %v1072_v26  ;;  %v1075_v30 = vadd.f32 %v1074_v28, %v1073_v27  ;;  %v707_v32 = vadd.f32 1e-08, %v1072_v26 }
 0x24f   :  { %v788_v31 = vadd.f32 50.0, %v1075_v30  ;;  %1190 = vlog2.f32 %v787_v29  ;;  %v708_v33 = vadd.f32 1e-08, %v1075_v30 }
 0x251   :  { %v1076_v34 = vpop.f32.mrb[4].mxu1  ;;  %1192 = vlog2.f32 %v788_v31 }
 0x252   :  { %v1077_v35 = vpop.f32.mrb[5].mxu1  ;;  %1194 = vlog2.f32 %v707_v32 }
 0x253   :  { %v1078_v36 = vadd.f32 %v1077_v35, %v1076_v34  ;;  %v1079_v37 = vpop.f32.mrb[6].mxu1  ;;  %1196 = vlog2.f32 %v708_v33 }
 0x254   :  { %v1080_v38 = vpop.f32.mrb[7].mxu1 }
 0x255   :  { %v709_v39 = vadd.f32 1e-08, %v1078_v36  ;;  %v789_v40 = vadd.f32 50.0, %v1078_v36  ;;  %v1081_v41 = vadd.f32 %v1080_v38, %v1079_v37 }
 0x257   :  { %v790_v42 = vadd.f32 50.0, %v1081_v41  ;;  %1198 = vlog2.f32 %v789_v40  ;;  %v710_v43 = vadd.f32 1e-08, %v1081_v41 }
 0x258   :  { %1200 = vlog2.f32 %v709_v39 }
 0x259   :  { %v1082_v44 = vpop.f32.mrb[8].mxu1  ;;  %v1191_v45 = vpop.eup %1190  ;;  %1202 = vlog2.f32 %v790_v42 }
 0x25a   :  { %v1083_v46 = vpop.f32.mrb[9].mxu1  ;;  %v1421_v49 = vmul.f32 0.6931472, %v1191_v45  ;;  %1204 = vlog2.f32 %v710_v43 }
 0x25b   :  { %v1084_v47 = vadd.f32 %v1083_v46, %v1082_v44  ;;  %v1085_v48 = vpop.f32.mrb[10].mxu1  ;;  %v1193_v50 = vpop.eup %1192 }
 0x25c   :  { %v1086_v51 = vpop.f32.mrb[11].mxu1  ;;  %811 = vrot.lane.b32.xlu0 %v1421_v49, %s1353_s0  ;;  %v1195_v55 = vpop.eup %1194  ;;  %v1425_v57 = vmul.f32 0.6931472, %v1193_v50 }
 0x25d   :  { %v711_v52 = vadd.f32 1e-08, %v1084_v47  ;;  %v791_v53 = vadd.f32 50.0, %v1084_v47  ;;  %v1087_v54 = vadd.f32 %v1086_v51, %v1085_v48  ;;  %v1197_v59 = vpop.eup %1196  ;;  %v716_v62 = vmul.f32 0.6931472, %v1195_v55 }
 0x25e   :  { %v718_v10 = vmul.f32 0.6931472, %v1197_v59 }
 0x25f   :  { %1206 = vlog2.f32 %v711_v52  ;;  %v712_v56 = vadd.f32 1e-08, %v1087_v54  ;;  %v792_v58 = vadd.f32 50.0, %v1087_v54  ;;  %v731_v9 = vmul.f32 0.23, %v716_v62 }
 0x260   :  { %1208 = vlog2.f32 %v791_v53  ;;  %813 = vrot.lane.b32.xlu0 %v1425_v57, %s1353_s0  ;;  %v732_v17 = vmul.f32 0.23, %v718_v10 }
 0x261   :  { %v1088_v60 = vpop.f32.mrb[12].mxu1  ;;  %v1199_v61 = vpop.eup %1198  ;;  %1210 = vlog2.f32 %v712_v56  ;;  %v739_v20 = vmul.f32 1.442695, %v731_v9 }
 0x262   :  { %v1089_v63 = vpop.f32.mrb[13].mxu1  ;;  %v1201_v0 = vpop.eup %1200  ;;  %v1429_v3 = vmul.f32 0.6931472, %v1199_v61  ;;  %1212 = vlog2.f32 %v792_v58  ;;  %v741_v26 = vmul.f32 1.442695, %v732_v17 }
 0x263   :  { %v1090_v1 = vadd.f32 %v1089_v63, %v1088_v60  ;;  %v1091_v2 = vpop.f32.mrb[14].mxu1  ;;  %v1203_v4 = vpop.eup %1202  ;;  %v720_v13 = vmul.f32 0.6931472, %v1201_v0 }
 0x264   :  { %v1092_v5 = vpop.f32.mrb[15].mxu1  ;;  %815 = vrot.lane.b32.xlu1 %v1429_v3, %s1353_s0  ;;  %v1205_v12 = vpop.eup %1204  ;;  %v1433_v15 = vmul.f32 0.6931472, %v1203_v4 }
 0x265   :  { %v713_v6 = vadd.f32 1e-08, %v1090_v1  ;;  %v793_v7 = vadd.f32 50.0, %v1090_v1  ;;  %v1093_v8 = vadd.f32 %v1092_v5, %v1091_v2  ;;  %v722_v18 = vmul.f32 0.6931472, %v1205_v12 }
 0x266   :  { %v733_v21 = vmul.f32 0.23, %v720_v13 }
 0x267   :  { %1214 = vlog2.f32 %v713_v6  ;;  %v714_v14 = vadd.f32 1e-08, %v1093_v8  ;;  %v794_v11 = vadd.f32 50.0, %v1093_v8  ;;  %v734_v27 = vmul.f32 0.23, %v722_v18 }
 0x268   :  { %1216 = vlog2.f32 %v793_v7  ;;  %817 = vrot.lane.b32.xlu1 %v1433_v15, %s1353_s0  ;;  %v743_v29 = vmul.f32 1.442695, %v733_v21 }
 0x269   :  { %v1207_v16 = vpop.eup %1206  ;;  %1218 = vlog2.f32 %v714_v14  ;;  %v745_v34 = vmul.f32 1.442695, %v734_v27 }
 0x26a   :  { %v1209_v19 = vpop.eup %1208  ;;  %v724_v23 = vmul.f32 0.6931472, %v1207_v16  ;;  %1220 = vlog2.f32 %v794_v11 }
 0x26b   :  { %v1437_v24 = vmul.f32 0.6931472, %v1209_v19  ;;  %v1211_v22 = vpop.eup %1210  ;;  %1222 = vpow2.f32 %v739_v20 }
 0x26c   :  { %v1213_v25 = vpop.eup %1212  ;;  %v726_v28 = vmul.f32 0.6931472, %v1211_v22  ;;  %v735_v30 = vmul.f32 0.23, %v724_v23  ;;  %1224 = vpow2.f32 %v741_v26 }
 0x26d   :  { %819 = vrot.lane.b32.xlu0 %v1437_v24, %s1353_s0  ;;  %v1441_v31 = vmul.f32 0.6931472, %v1213_v25  ;;  %1226 = vpow2.f32 %v743_v29 }
 0x26e   :  { %v736_v35 = vmul.f32 0.23, %v726_v28  ;;  %v747_v37 = vmul.f32 1.442695, %v735_v30  ;;  %1228 = vpow2.f32 %v745_v34 }
 0x26f   :  { %821 = vrot.lane.b32.xlu1 %v1441_v31, %s1353_s0 }
 0x270   :  { %v749_v42 = vmul.f32 1.442695, %v736_v35  ;;  %1230 = vpow2.f32 %v747_v37 }
 0x271   :  { %v1215_v32 = vpop.eup %1214 }
 0x272   :  { %v728_v33 = vmul.f32 0.6931472, %v1215_v32  ;;  %v1217_v36 = vpop.eup %1216 }
 0x273   :  { %v1445_v39 = vmul.f32 0.6931472, %v1217_v36  ;;  %v1219_v40 = vpop.eup %1218 }
 0x274   :  { %v737_v38 = vmul.f32 0.23, %v728_v33  ;;  %v1221_v41 = vpop.eup %1220  ;;  %v730_v44 = vmul.f32 0.6931472, %v1219_v40 }
 0x275   :  { %823 = vrot.lane.b32.xlu0 %v1445_v39, %s1353_s0  ;;  %v1449_v45 = vmul.f32 0.6931472, %v1221_v41  ;;  %v1451_v47 = vpop.eup %1222 }
 0x276   :  { %v751_v43 = vmul.f32 1.442695, %v737_v38  ;;  %v738_v46 = vmul.f32 0.23, %v730_v44  ;;  %v1457_v50 = vpop.eup %1224 }
 0x277   :  { %825 = vrot.lane.b32.xlu1 %v1449_v45, %s1353_s0  ;;  %v1459_v51 = vpop.eup %1226 }
 0x278   :  { %1232 = vpow2.f32 %v751_v43  ;;  %v753_v48 = vmul.f32 1.442695, %v738_v46  ;;  %v1465_v52 = vpop.eup %1228 }
 0x279   :  { %1234 = vpow2.f32 %v749_v42  ;;  %755 = vrot.lane.b32.xlu0 %v1451_v47, %s1353_s0 }
 0x27a   :  { %1236 = vpow2.f32 %v753_v48  ;;  %v1467_v53 = vpop.eup %1230 }
 0x27b   :  { %757 = vrot.lane.b32.xlu1 %v1457_v50, %s1353_s0 }
 0x27d   :  { %759 = vrot.lane.b32.xlu0 %v1459_v51, %s1353_s0 }
 0x27f   :  { %761 = vrot.lane.b32.xlu1 %v1465_v52, %s1353_s0 }
 0x281   :  { %763 = vrot.lane.b32.xlu0 %v1467_v53, %s1353_s0 }
 0x282   :  { %v1473_v54 = vpop.eup %1232 }
 0x283   :  { %v1475_v55 = vpop.eup %1234 }
 0x284   :  { %765 = vrot.lane.b32.xlu1 %v1475_v55, %s1353_s0  ;;  %v1479_v56 = vpop.eup %1236 }
 0x285   :  { %767 = vrot.lane.b32.xlu0 %v1473_v54, %s1353_s0 }
 0x288   :  { %769 = vrot.lane.b32.xlu1 %v1479_v56, %s1353_s0 }
 0x2ce   :  { %v812_v58 = vpop.permute.xlu0 %811 }
 0x2cf   :  { %v827_v59 = vsub.f32 %v1421_v49, %v812_v58 }
 0x2d1   :  { %v835_v62 = vmul.f32 1.2, %v827_v59 }
 0x2d2   :  { %v814_v60 = vpop.permute.xlu0 %813 }
 0x2d3   :  { %v828_v61 = vsub.f32 %v1425_v57, %v814_v60  ;;  %v843_v4 = vmul.f32 1.442695, %v835_v62 }
 0x2d5   :  { %v836_v0 = vmul.f32 1.2, %v828_v61  ;;  %1238 = vpow2.f32 %v843_v4 }
 0x2d6   :  { %v816_v63 = vpop.permute.xlu1 %815 }
 0x2d7   :  { %v829_v1 = vsub.f32 %v1429_v3, %v816_v63  ;;  %v845_v6 = vmul.f32 1.442695, %v836_v0 }
 0x2d9   :  { %v837_v2 = vmul.f32 1.2, %v829_v1  ;;  %1240 = vpow2.f32 %v845_v6 }
 0x2da   :  { %v818_v5 = vpop.permute.xlu1 %817 }
 0x2db   :  { %v830_v7 = vsub.f32 %v1433_v15, %v818_v5  ;;  %v847_v8 = vmul.f32 1.442695, %v837_v2  ;;  %v891_v15 = vlaneseq }
 0x2dd   :  { %v838_v9 = vmul.f32 1.2, %v830_v7  ;;  %1242 = vpow2.f32 %v847_v8  ;;  %v1493_v26 = vand.u32 127, %v891_v15 }
 0x2df   :  { %v849_v10 = vmul.f32 1.442695, %v838_v9  ;;  %v820_v49 = vpop.permute.xlu0 %819  ;;  %v1239_v18 = vpop.eup %1238  ;;  %vm893_vm3 = vcmp.lt.s32.totalorder %v1493_v26, 64 }
 0x2e0   :  { %v831_v57 = vsub.f32 %v1437_v24, %v820_v49  ;;  %v867_v25 = vmin.f32 %v1239_v18, 12.0  ;;  %vm859_vm0 = vcmp.lt.f32.partialorder %v1239_v18, 3.0 }
 0x2e1   :  { %v822_v13 = vpop.permute.xlu1 %821  ;;  %1244 = vpow2.f32 %v849_v10 }
 0x2e2   :  { %v839_v12 = vmul.f32 1.2, %v831_v57  ;;  %v832_v3 = vsub.f32 %v1441_v31, %v822_v13  ;;  %v875_v37 = vsel %vm859_vm0, 0.0, %v867_v25 }
 0x2e3   :  { %v1241_v20 = vpop.eup %1240 }
 0x2e4   :  { %v851_v14 = vmul.f32 1.442695, %v839_v12  ;;  %v840_v11 = vmul.f32 1.2, %v832_v3  ;;  %v868_v32 = vmin.f32 %v1241_v20, 12.0  ;;  %vm860_vm1 = vcmp.lt.f32.partialorder %v1241_v20, 3.0 }
 0x2e6   :  { %1246 = vpow2.f32 %v851_v14  ;;  %v853_v16 = vmul.f32 1.442695, %v840_v11  ;;  %v876_v44 = vsel %vm860_vm1, 0.0, %v868_v32 }
 0x2e7   :  { %v824_v17 = vpop.permute.xlu0 %823  ;;  %v1243_v21 = vpop.eup %1242 }
 0x2e8   :  { %v833_v19 = vsub.f32 %v1445_v39, %v824_v17  ;;  %1248 = vpow2.f32 %v853_v16  ;;  %v869_v34 = vmin.f32 %v1243_v21, 12.0  ;;  %vm861_vm2 = vcmp.lt.f32.partialorder %v1243_v21, 3.0 }
 0x2e9   :  { %v826_v22 = vpop.permute.xlu1 %825 }
 0x2ea   :  { %v841_v23 = vmul.f32 1.2, %v833_v19  ;;  %v834_v24 = vsub.f32 %v1449_v45, %v826_v22  ;;  %v877_v46 = vsel %vm861_vm2, 0.0, %v869_v34 }
 0x2eb   :  { %v756_v27 = vpop.permute.xlu0 %755  ;;  %v1245_v30 = vpop.eup %1244 }
 0x2ec   :  { %v855_v28 = vmul.f32 1.442695, %v841_v23  ;;  %v771_v29 = vsub.f32 %v1451_v47, %v756_v27  ;;  %v842_v31 = vmul.f32 1.2, %v834_v24  ;;  %v870_v43 = vmin.f32 %v1245_v30, 12.0 }
 0x2ed   :  { %v758_v33 = vpop.permute.xlu1 %757  ;;  %vm862_vm4 = vcmp.lt.f32.partialorder %v1245_v30, 3.0 }
 0x2ee   :  { %1250 = vpow2.f32 %v855_v28  ;;  %v779_v35 = vand.u32 2147483647, %v771_v29  ;;  %v857_v36 = vmul.f32 1.442695, %v842_v31  ;;  %v772_v38 = vsub.f32 %v1457_v50, %v758_v33 }
 0x2ef   :  { %v760_v39 = vpop.permute.xlu0 %759  ;;  %v878_v0 = vsel %vm862_vm4, 0.0, %v870_v43 }
 0x2f0   :  { %v1247_v40 = vpop.eup %1246  ;;  %v883_v41 = vmul.f32 %v875_v37, %v779_v35  ;;  %v773_v42 = vsub.f32 %v1459_v51, %v760_v39  ;;  %v780_v45 = vand.u32 2147483647, %v772_v38  ;;  %1252 = vpow2.f32 %v857_v36 }
 0x2f1   :  { %v762_v58 = vpop.permute.xlu1 %761  ;;  %v871_v59 = vmin.f32 %v1247_v40, 12.0  ;;  %vm863_vm5 = vcmp.lt.f32.partialorder %v1247_v40, 3.0 }
 0x2f2   :  { %v894_v47 = vsel %vm893_vm3, %v779_v35, %v883_v41  ;;  %v781_v48 = vand.u32 2147483647, %v773_v42  ;;  %v1249_v60 = vpop.eup %1248  ;;  %v884_v50 = vmul.f32 %v876_v44, %v780_v45  ;;  %v774_v62 = vsub.f32 %v1465_v52, %v762_v58 }
 0x2f3   :  { %v902_v61 = vrot.slane %v894_v47, 4  ;;  %v764_v63 = vpop.permute.xlu0 %763  ;;  %v872_v2 = vmin.f32 %v1249_v60, 12.0  ;;  %vm864_vm6 = vcmp.lt.f32.partialorder %v1249_v60, 3.0  ;;  %v879_v9 = vsel %vm863_vm5, 0.0, %v871_v59 }
 0x2f4   :  { %v885_v51 = vmul.f32 %v877_v46, %v781_v48  ;;  %v775_v1 = vsub.f32 %v1467_v53, %v764_v63  ;;  %v895_v5 = vsel %vm893_vm3, %v780_v45, %v884_v50  ;;  %v782_v6 = vand.u32 2147483647, %v774_v62 }
 0x2f5   :  { %v903_v4 = vadd.f32 %v902_v61, %v894_v47  ;;  %v908_v7 = vrot.slane %v895_v5, 4  ;;  %v880_v16 = vsel %vm864_vm6, 0.0, %v872_v2 }
 0x2f6   :  { %v896_v8 = vsel %vm893_vm3, %v781_v48, %v885_v51  ;;  %v783_v10 = vand.u32 2147483647, %v775_v1  ;;  %v766_v52 = vpop.permute.xlu1 %765  ;;  %v886_v12 = vmul.f32 %v878_v0, %v782_v6 }
 0x2f7   :  { %v904_v49 = vrot.slane %v903_v4, 2  ;;  %v914_v57 = vrot.slane %v896_v8, 4  ;;  %v776_v53 = vsub.f32 %v1475_v55, %v766_v52  ;;  %v768_v13 = vpop.permute.xlu0 %767  ;;  %v909_v14 = vadd.f32 %v908_v7, %v895_v5 }
 0x2f8   :  { %v1251_v3 = vpop.eup %1250  ;;  %v887_v11 = vmul.f32 %v879_v9, %v783_v10  ;;  %v777_v17 = vsub.f32 %v1473_v54, %v768_v13  ;;  %v897_v19 = vsel %vm893_vm3, %v782_v6, %v886_v12 }
 0x2f9   :  { %v905_v15 = vadd.f32 %v904_v49, %v903_v4  ;;  %v915_v18 = vadd.f32 %v914_v57, %v896_v8  ;;  %v784_v20 = vand.u32 2147483647, %v776_v53  ;;  %v910_v21 = vrot.slane %v909_v14, 2 }
 0x2fa   :  { %v920_v23 = vrot.slane %v897_v19, 4  ;;  %v898_v22 = vsel %vm893_vm3, %v783_v10, %v887_v11  ;;  %vm865_vm8 = vcmp.lt.f32.partialorder %v1251_v3, 3.0  ;;  %v1253_v28 = vpop.eup %1252  ;;  %v873_v30 = vmin.f32 %v1251_v3, 12.0  ;;  %v770_v40 = vpop.permute.xlu1 %769 }
 0x2fb   :  { %v906_v55 = vrot.slane %v905_v15, 1  ;;  %v916_v24 = vrot.slane %v915_v18, 2  ;;  %v926_v25 = vrot.slane %v898_v22, 4  ;;  %v888_v27 = vmul.f32 %v880_v16, %v784_v20 }
 0x2fc   :  { %v911_v29 = vadd.f32 %v910_v21, %v909_v14  ;;  %v921_v54 = vadd.f32 %v920_v23, %v897_v19  ;;  %v785_v31 = vand.u32 2147483647, %v777_v17  ;;  %v881_v39 = vsel %vm865_vm8, 0.0, %v873_v30 }
 0x2fd   :  { %v907_v32 = vadd.f32 %v906_v55, %v905_v15  ;;  %v917_v34 = vadd.f32 %v916_v24, %v915_v18  ;;  %v927_v35 = vadd.f32 %v926_v25, %v898_v22  ;;  %v899_v33 = vsel %vm893_vm3, %v784_v20, %v888_v27 }
 0x2fe   :  { %v912_v36 = vrot.slane %v911_v29, 1  ;;  %v922_v37 = vrot.slane %v921_v54, 2  ;;  %v932_v38 = vrot.slane %v899_v33, 4  ;;  %v889_v43 = vmul.f32 %v881_v39, %v785_v31 }
 0x2ff   :  { %v918_v41 = vrot.slane %v917_v34, 1  ;;  %v928_v42 = vrot.slane %v927_v35, 2  ;;  %vm866_vm10 = vcmp.lt.f32.partialorder %v1253_v28, 3.0  ;;  %v874_v47 = vmin.f32 %v1253_v28, 12.0 }
 0x300   :  { %v913_v44 = vadd.f32 %v912_v36, %v911_v29  ;;  %v923_v45 = vadd.f32 %v922_v37, %v921_v54  ;;  %v933_v46 = vadd.f32 %v932_v38, %v899_v33  ;;  %v900_v59 = vsel %vm893_vm3, %v785_v31, %v889_v43 }
 0x301   :  { %v919_v48 = vadd.f32 %v918_v41, %v917_v34  ;;  %v929_v58 = vadd.f32 %v928_v42, %v927_v35  ;;  %v778_v60 = vsub.f32 %v1479_v56, %v770_v40  ;;  %v938_v63 = vrot.slane %v900_v59, 4 }
 0x302   :  { %v959_v61 = vsel %vm958_vm7, %v913_v44, %v907_v32  ;;  %v924_v50 = vrot.slane %v923_v45, 1  ;;  %v934_v62 = vrot.slane %v933_v46, 2  ;;  %v882_v0 = vsel %vm866_vm10, 0.0, %v874_v47 }
 0x303   :  { %v930_v51 = vrot.slane %v929_v58, 1  ;;  %v786_v1 = vand.u32 2147483647, %v778_v60  ;;  %v939_v5 = vadd.f32 %v938_v63, %v900_v59  ;;  %v961_v7 = vsel %vm960_vm9, %v919_v48, %v959_v61 }
 0x304   :  { %v925_v2 = vadd.f32 %v924_v50, %v923_v45  ;;  %v935_v4 = vadd.f32 %v934_v62, %v933_v46 }
 0x305   :  { %v890_v6 = vmul.f32 %v882_v0, %v786_v1  ;;  %v940_v9 = vrot.slane %v939_v5, 2  ;;  %v931_v10 = vadd.f32 %v930_v51, %v929_v58 }
 0x306   :  { %v936_v8 = vrot.slane %v935_v4, 1  ;;  %v963_v57 = vsel %vm962_vm11, %v925_v2, %v961_v7 }
 0x307   :  { %v901_v56 = vsel %vm893_vm3, %v786_v1, %v890_v6  ;;  %v941_v52 = vadd.f32 %v940_v9, %v939_v5  ;;  %v965_v3 = vsel %vm964_vm12, %v931_v10, %v963_v57 }
 0x308   :  { %v944_v49 = vrot.slane %v901_v56, 4  ;;  %v937_v12 = vadd.f32 %v936_v8, %v935_v4 }
 0x309   :  { %v942_v53 = vrot.slane %v941_v52, 1 }
 0x30a   :  { %v945_v13 = vadd.f32 %v944_v49, %v901_v56  ;;  %v967_v17 = vsel %vm966_vm13, %v937_v12, %v965_v3 }
 0x30b   :  { %v943_v11 = vadd.f32 %v942_v53, %v941_v52 }
 0x30c   :  { %v946_v14 = vrot.slane %v945_v13, 2 }
 0x30d   :  { %v969_v18 = vsel %vm968_vm14, %v943_v11, %v967_v17 }
 0x30e   :  { %v947_v16 = vadd.f32 %v946_v14, %v945_v13 }
 0x310   :  { %v948_v15 = vrot.slane %v947_v16, 1 }
 0x312   :  { %v949_v26 = vadd.f32 %v948_v15, %v947_v16 }
 0x314   :  { %v971_v19 = vsel %vm970_vm15, %v949_v26, %v969_v18 }
 0x315   :  { %973 = vst [vmem:[#allocation8] sm:$0xff] %v971_v19 }
 0x316   :  { %1331 = shalt.err (!%p1328_p0)
}
 0x317   :  { %s1332_s27 = scalar_lea.hbm %s1538_s3, 128 }
 0x318   :  { %p1333_p1 = scmp.ne.s32.totalorder %s1538_s3, %s1332_s27  ;;  %p1336_p2 = scmp.lt.u32.totalorder %s1332_s27, %s1538_s3 }
 0x31a   :  { %p1338_p3 = pnand %p1336_p2, %p1333_p1 }
 0x31c   :  { %1341 = shalt.err (!%p1338_p3)
}
 0x31d   :  { %983 = dma.vmem_to_hbm [thread:$0]  %s981_s23, 128, %s1538_s3, [#allocation4]  }
 0x31e   :  { %1346 = dma.done.wait [#allocation4], 128  }
 0x31f   :  { %1347 = vsyncadd [#allocation4], 4294967168 }
 0x320   :  { %987 = vsyncpa [#allocation3], 1 }
 0x321   :  { %988 = vsyncpa [#allocation6], 1 }
 0x322   :  { %989 = vsyncpa [#allocation4], 1 }

</bundles_post_ra>
